<compile_context>
chip_gen: v7x
topology: tpu7x:2x2x1
jax: 0.10.0
libtpu: 0.0.40
codegen_flags: <defaults>
</compile_context>

<pallas_src>
import numpy as np
import jax
import jax.numpy as jnp
from jax.experimental import pallas as pl
from jax.experimental.pallas import tpu as pltpu


def _copy_kernel(x_ref, o_ref):
    # Flatten has zero arithmetic; the kernel only moves the current block.
    o_ref[...] = x_ref[...]


_MAX_LANE_COLS = 4096  # lane-dense slab width cap (multiple of 128)


def _hw_params():
    """(block_bytes, vmem_limit_bytes) tuned per TPU generation."""
    block_bytes = 4 * 1024 * 1024
    vmem_limit = 32 * 1024 * 1024
    try:
        info = pltpu.get_tpu_info()
        vmem_cap = int(getattr(info, "vmem_capacity_bytes", 0) or 0)
        if vmem_cap >= 128 * 1024 * 1024:
            # v5e / v6e: 128 MiB physical VMEM -> bigger blocks, 64 MiB scoped budget.
            block_bytes = 6 * 1024 * 1024
            vmem_limit = 64 * 1024 * 1024
        elif vmem_cap > 0:
            # v7x: 64 MiB physical / 32 MiB scoped -> ~4 MiB blocks (4 live bufs = 16 MiB).
            block_bytes = 4 * 1024 * 1024
            vmem_limit = 32 * 1024 * 1024
    except Exception:
        pass  # conservative defaults work on every generation
    return block_bytes, vmem_limit


def _sublane_quantum(itemsize):
    # vreg sublane tile scales with packing: f32 -> 8 rows, bf16 -> 16, int8/fp8 -> 32.
    return {8: 8, 4: 8, 2: 16, 1: 32}.get(itemsize, None)


def _lane_dense_cols(total):
    """Largest C = 128*k (C <= _MAX_LANE_COLS) dividing `total`, else None."""
    for k in range(_MAX_LANE_COLS // 128, 0, -1):
        c = 128 * k
        if total % c == 0:
            return c
    return None


def _best_divisor_cols(total, max_cols):
    """Largest divisor of `total` that is <= max_cols (non-multiple-of-128 fallback)."""
    best = 1
    d = 1
    while d * d <= total:
        if total % d == 0:
            for c in (d, total // d):
                if c <= max_cols and c > best:
                    best = c
        d += 1
    return best


def _tiled_copy(x2d, tile_rows, *, donate, vmem_limit):
    rows, cols = x2d.shape
    itemsize = x2d.dtype.itemsize
    extra = {}
    if donate:
        # Only alias when the caller actually donates the input buffer; otherwise
        # XLA inserts a defensive copy and HBM traffic doubles.
        extra["input_output_aliases"] = {0: 0}
    return pl.pallas_call(
        _copy_kernel,
        out_shape=jax.ShapeDtypeStruct((rows, cols), x2d.dtype),
        grid=(pl.cdiv(rows, tile_rows),),
        in_specs=[pl.BlockSpec((tile_rows, cols), lambda i: (i, 0))],
        out_specs=pl.BlockSpec((tile_rows, cols), lambda i: (i, 0)),
        compiler_params=pltpu.CompilerParams(
            dimension_semantics=("parallel",),
            vmem_limit_bytes=vmem_limit,
        ),
        cost_estimate=pl.CostEstimate(
            flops=0,
            transcendentals=0,
            bytes_accessed=2 * rows * cols * itemsize,
        ),
        **extra,
    )(x2d)


def pallas_flatten(x, start_dim, end_dim, *, donate=False):
    """Equivalent of torch.flatten(x, start_dim, end_dim) on TPU via Pallas."""
    nd = max(x.ndim, 1)
    sd = start_dim % nd
    ed = end_dim % nd
    # torch.flatten also raises when end_dim < start_dim after normalization.
    assert sd <= ed, "start_dim must be <= end_dim (after normalization)"

    merged = int(np.prod(x.shape[sd:ed + 1])) if x.ndim else 1
    out_shape = x.shape[:sd] + (merged,) + x.shape[ed + 1:]

    total = int(np.prod(x.shape)) if x.ndim else 1
    itemsize = int(np.dtype(x.dtype).itemsize)
    q = _sublane_quantum(itemsize)

    if total == 0 or q is None:
        # Empty tensors or sub-byte dtypes: metadata-only reshape, nothing to copy.
        # TODO(synk): sub-byte dtypes (int4/fp4) would need 64-row sublane tiling.
        return jnp.reshape(x, out_shape)

    block_bytes, vmem_limit = _hw_params()

    cols = _lane_dense_cols(total)
    if cols is None:
        # total not a multiple of 128: pick the largest divisor as the lane
        # width (block == full lane extent satisfies the tiling rule) so the
        # row axis stays sublane-dense and tileable.
        cols = _best_divisor_cols(total, _MAX_LANE_COLS)
    rows = total // cols

    # Metadata-only reshape to the 2D copy slab.
    x2d = jnp.reshape(x, (rows, cols))

    row_bytes = cols * itemsize
    if rows * row_bytes <= block_bytes:
        # Fits in one block: single grid step, block equals full array extent.
        tile_rows = rows
    else:
        # Target ~block_bytes per block, dtype-aware sublane quantization.
        tile_rows = max(q, (block_bytes // row_bytes) // q * q)
        # Guarantee >= 2 balanced grid steps so v7x's two TensorCores both get work.
        half = -(-rows // 2)          # ceil(rows / 2)
        half = -(-half // q) * q      # round up to sublane quantum
        tile_rows = min(tile_rows, max(q, half))

    out2d = _tiled_copy(x2d, tile_rows, donate=donate, vmem_limit=vmem_limit)
    return jnp.reshape(out2d, out_shape)


class FlattenModule:
    """JAX/Pallas port of the PyTorch FlattenModule."""

    def __init__(self, start_dim, end_dim):
        self.start_dim = start_dim
        self.end_dim = end_dim

    def __call__(self, x):
        return pallas_flatten(x, self.start_dim, self.end_dim)


if __name__ == "__main__":
    key = jax.random.PRNGKey(0)
    k0, k1, k2 = jax.random.split(key, 3)

    # Small NCHW-style input consistent with the module's typical use.
    x = jax.random.normal(k0, (2, 4, 16, 16), dtype=jnp.float32)
    mod = FlattenModule(start_dim=1, end_dim=-1)
    y = jax.block_until_ready(mod(x))

    y_ref = jnp.reshape(x, (2, 4 * 16 * 16))  # == torch.flatten(x, 1, -1)
    assert y.shape == (2, 1024), y.shape
    assert y.dtype == x.dtype
    np.testing.assert_array_equal(np.asarray(y), np.asarray(y_ref))

    # Non-multiple-of-128 fallback path (total = 105).
    x2 = jax.random.normal(k1, (3, 5, 7), dtype=jnp.float32)
    y2 = jax.block_until_ready(FlattenModule(0, 1)(x2))
    np.testing.assert_array_equal(np.asarray(y2), np.asarray(jnp.reshape(x2, (15, 7))))

    # bf16 path (16-row sublane quantum), partial flatten in the middle dims.
    x3 = jax.random.normal(k2, (2, 8, 16, 16), dtype=jnp.bfloat16)
    y3 = jax.block_until_ready(FlattenModule(1, 2)(x3))
    np.testing.assert_array_equal(
        np.asarray(y3), np.asarray(jnp.reshape(x3, (2, 128, 16))))

    print("KERNEL_OK")
</pallas_src>

<mosaic_0001>
module attributes {stable_mosaic.version = 11 : i64} {
  func.func @_copy_kernel(%arg0: i32, %arg1: memref<1x2048xf32, #tpu.memory_space<vmem>>, %arg2: memref<1x2048xf32, #tpu.memory_space<vmem>>) attributes {dimension_semantics = [#tpu.dimension_semantics<parallel>], iteration_bounds = array<i64: 1>, scalar_prefetch = 0 : i64, scratch_operands = 0 : i64, tpu.core_type = #tpu.core_type<tc>, window_params = [{transform_indices = @transform_0, window_bounds = array<i64: 1, 2048>}, {transform_indices = @transform_1, window_bounds = array<i64: 1, 2048>}]} {
    %c0 = arith.constant 0 : index
    %c0_0 = arith.constant 0 : index
    %0 = vector.load %arg1[%c0, %c0_0] : memref<1x2048xf32, #tpu.memory_space<vmem>>, vector<1x2048xf32>
    %c0_1 = arith.constant 0 : index
    %c0_2 = arith.constant 0 : index
    %1 = vector.load %arg2[%c0_1, %c0_2] : memref<1x2048xf32, #tpu.memory_space<vmem>>, vector<1x2048xf32>
    tpu.vector_store %arg2[%c0_1, %c0_2], %0 {strides = array<i32>} : memref<1x2048xf32, #tpu.memory_space<vmem>>, vector<1x2048xf32>,
    return
  }
  func.func @transform_0(%arg0: i32) -> (i32, i32) {
    %c0_i32 = arith.constant 0 : i32
    %c0_i32_0 = arith.constant 0 : i32
    return %arg0, %c0_i32 : i32, i32
  }
  func.func @transform_1(%arg0: i32) -> (i32, i32) {
    %c0_i32 = arith.constant 0 : i32
    %c0_i32_0 = arith.constant 0 : i32
    return %arg0, %c0_i32 : i32, i32
  }
}

</mosaic_0001>

<bundles_post_ra>
// kernel: tpu_custom_call.1
= control target key start
LH: loop header
LB: loop body
LE: loop exit
PB: predicated region body
PF: predicated region fallthrough
CT: control target
= control target key end

     0   :  { %6 = vsyncpa [#allocation3], 0  ;;  %s126_s0 = inlined_call_operand.hbm [shape: f32[1,2048], index: 0, kind: input, shape index: {}]   ;;  %s127_s1 = inlined_call_operand.hbm [shape: f32[1,2048], index: 1, kind: output, shape index: {}]  }
   0x1   :  { %7 = vsyncpa [#allocation4], 0  ;;  %s90_s6 = smov [#allocation2]   ;;  %s42_s10 = scalar_lea.hbm %s126_s0, 256 }
   0x2   :  { %s14_s7 = sshll.u32 %s90_s6, 4  ;;  %p43_p0 = scmp.ne.s32.totalorder %s126_s0, %s42_s10  ;;  %s15_s7 = int_to_ptr.vmem [resolvable:$true] %s14_s7 }
   0x3   :  { %p46_p1 = scmp.lt.u32.totalorder %s42_s10, %s126_s0 }
   0x5   :  { %p48_p2 = pnand %p46_p1, %p43_p0 }
   0x7   :  { %51 = shalt.err (!%p48_p2)
}
   0x8   :  { %s52_s15 = scalar_lea.vmem %s15_s7, 256  ;;  %p57_p4 = scmp.lt.s32.totalorder %s15_s7, %s15_s7 }
   0x9   :  { %p53_p3 = scmp.ne.s32.totalorder %s15_s7, %s52_s15  ;;  %p58_p5 = scmp.lt.s32.totalorder %s52_s15, %s52_s15 }
   0xb   :  { %p59_p6 = por %p58_p5, %p57_p4 }
   0xd   :  { %p60_p7 = pnand %p59_p6, %p53_p3 }
   0xf   :  { %63 = shalt.err (!%p60_p7)
}
  0x10   :  { %17 = dma.hbm_to_vmem [thread:$0]  %s126_s0, 256, %s15_s7, [#allocation3]  }
  0x11   :  { %86 = dma.done.wait [#allocation3], 256  }
  0x12   :  { %87 = vsyncadd [#allocation3], 4294967040  ;;  %s91_s18 = smov [#allocation5]   ;;  %v21_v0 = vld [vmem:[#allocation2] sm:$0xff]  ;;  %v22_v1 = vld [vmem:[#allocation2 + $0x8] sm:$0xff] }
  0x13   :  { %s31_s19 = sshll.u32 %s91_s18, 4  ;;  %23 = vst [vmem:[#allocation5] sm:$0xff] %v21_v0  ;;  %24 = vst [vmem:[#allocation5 + $0x8] sm:$0xff] %v22_v1  ;;  %s32_s19 = int_to_ptr.vmem [resolvable:$true] %s31_s19 }
  0x14   :  { %s64_s20 = scalar_lea.vmem %s32_s19, 256  ;;  %p69_p9 = scmp.lt.s32.totalorder %s32_s19, %s32_s19 }
  0x15   :  { %p65_p8 = scmp.ne.s32.totalorder %s32_s19, %s64_s20  ;;  %p70_p10 = scmp.lt.s32.totalorder %s64_s20, %s64_s20 }
  0x17   :  { %p71_p11 = por %p70_p10, %p69_p9 }
  0x19   :  { %p72_p12 = pnand %p71_p11, %p65_p8 }
  0x1b   :  { %75 = shalt.err (!%p72_p12)
}
  0x1c   :  { %s76_s0 = scalar_lea.hbm %s127_s1, 256 }
  0x1d   :  { %p77_p13 = scmp.ne.s32.totalorder %s127_s1, %s76_s0  ;;  %p80_p0 = scmp.lt.u32.totalorder %s76_s0, %s127_s1 }
  0x1f   :  { %p82_p1 = pnand %p80_p0, %p77_p13 }
  0x21   :  { %85 = shalt.err (!%p82_p1)
}
  0x22   :  { %34 = dma.vmem_to_hbm [thread:$0]  %s32_s19, 256, %s127_s1, [#allocation4]  }
  0x23   :  { %88 = dma.done.wait [#allocation4], 256  }
  0x24   :  { %89 = vsyncadd [#allocation4], 4294967040 }
  0x25   :  { %38 = vsyncpa [#allocation3], 1 }
  0x26   :  { %39 = vsyncpa [#allocation4], 1 }

</bundles_post_ra>
